<compile_context>
chip_gen: v6e
topology: v6e:2x2x1
jax: 0.10.0
libtpu: 0.0.40
codegen_flags: <defaults>
</compile_context>

<pallas_src>
import functools

import jax
import jax.numpy as jnp
import numpy as np
from jax import lax
from jax.experimental import pallas as pl
from jax.experimental.pallas import tpu as pltpu


_DEFAULT_SPLITS = 2   # split-K width: feeds both v7x TensorCores; harmless
                      # (sequential) on single-TC v5e/v6e.


def _round_up(x, m):
    return (x + m - 1) // m * m


def _round_down(x, m):
    return x // m * m


def _cdiv(a, b):
    return -(-a // b)


def _features(x_nchw):
    """NCHW (batch must be 1, as in the PyTorch gram_matrix) -> (C, H*W)."""
    b, c, h, w = x_nchw.shape
    assert b == 1, "gram_matrix's view(ch, h*w) requires batch_size == 1"
    return x_nchw.reshape(c, h * w)


def _hw_config():
    """(per-feature-buffer byte budget, vmem_limit_bytes) for this TPU gen."""
    vmem_bytes = 64 << 20                       # conservative fallback (v7x)
    try:
        info = pltpu.get_tpu_info()
        vmem_bytes = int(getattr(info, "vmem_capacity_bytes", vmem_bytes))
    except Exception:
        pass
    if vmem_bytes >= (96 << 20):                # v5e / v6e: 128 MiB physical
        return 12 << 20, 96 << 20
    return 5 << 20, 48 << 20                    # v7x: 64 MiB physical


def _choose_tiling(c, n, itemsize, tile_n, num_splits):
    """Byte-budgeted, balanced tiling of the H*W contraction axis."""
    per_buf_bytes, vmem_limit = _hw_config()
    if tile_n is None:
        tn = _round_down(per_buf_bytes // max(c * itemsize, 1), 128)
    else:
        tn = _round_up(tile_n, 128)
    tn = max(128, min(tn, _round_up(n, 128)))
    steps = _cdiv(n, tn)
    # Balance the tiles: caps the masked tail over-read at < 128 lanes.
    tn = max(128, _round_up(_cdiv(n, steps), 128))
    steps = _cdiv(n, tn)
    splits = max(1, min(num_splits, steps))
    spp = _cdiv(steps, splits)                  # grid steps per split
    needs_mask = (splits * spp * tn != n)
    return tn, steps, splits, spp, needs_mask, vmem_limit


# ---------------------------------------------------------------------------
# Kernels
# ---------------------------------------------------------------------------
def _masked_tile(x, rem):
    """Zero out lanes >= rem (OOB tail of the last tile / phantom tiles)."""
    lane = lax.broadcasted_iota(jnp.int32, x.shape, 1)
    return jnp.where(lane < rem, x, jnp.zeros_like(x))


def _accumulate_gram(x, acc_ref):
    # acc += X @ X.T without materializing the transpose: contract the lane
    # (H*W) axis of both operands directly on the MXU, accumulate in f32.
    acc_ref[...] += lax.dot_general(
        x, x,
        dimension_numbers=(((1,), (1,)), ((), ())),
        preferred_element_type=jnp.float32,
    )


def _partial_gram_kernel(feat_ref, g_ref, acc_ref, *, n, tn, spp, inv_cn,
                         needs_mask):
    s = pl.program_id(0)   # split-K index ("parallel": one per TC on v7x)
    k = pl.program_id(1)   # streamed contraction step ("arbitrary")

    @pl.when(k == 0)
    def _init():
        acc_ref[...] = jnp.zeros_like(acc_ref)

    x = feat_ref[...]
    if needs_mask:
        rem = n - (s * spp + k) * tn       # <= 0 for phantom tiles -> all zero
        x = _masked_tile(x, rem)
    _accumulate_gram(x, acc_ref)

    @pl.when(k == spp - 1)
    def _finalize():
        g_ref[...] = (acc_ref[...] * inv_cn)[None].astype(g_ref.dtype)


def _fused_style_loss_kernel(feat_ref, tgt_ref, loss_ref, acc_ref, *, n, tn,
                             inv_cn, inv_cc, needs_mask):
    k = pl.program_id(0)

    @pl.when(k == 0)
    def _init():
        acc_ref[...] = jnp.zeros_like(acc_ref)

    x = feat_ref[...]
    if needs_mask:
        x = _masked_tile(x, n - k * tn)
    _accumulate_gram(x, acc_ref)

    @pl.when(k == pl.num_programs(0) - 1)
    def _finalize():
        g = acc_ref[...] * inv_cn
        diff = g - tgt_ref[...].astype(jnp.float32)
        # Two-stage reduction keeps vreg pressure low for large C.
        row = jnp.sum(diff * diff, axis=-1, keepdims=True)
        loss_ref[...] = jnp.full((1, 1), jnp.sum(row) * inv_cc,
                                 dtype=jnp.float32)


# ---------------------------------------------------------------------------
# Wrappers
# ---------------------------------------------------------------------------
def gram_matrix_pallas(features, *, tile_n=None, num_splits=_DEFAULT_SPLITS):
    """G = (F @ F.T) / (C * N) for F of shape (C, N), streamed over N."""
    c, n = features.shape
    tn, steps, splits, spp, needs_mask, vmem_limit = _choose_tiling(
        c, n, features.dtype.itemsize, tile_n, num_splits)

    if splits * spp > steps:
        # The last split has phantom trailing tiles; clamp their DMA to the
        # last valid tile (the kernel masks their contribution to zero).
        last = steps - 1
        feat_map = lambda s, k: (0, jnp.minimum(s * spp + k, last))
    else:
        feat_map = lambda s, k: (0, s * spp + k)

    kernel = functools.partial(_partial_gram_kernel, n=n, tn=tn, spp=spp,
                               inv_cn=1.0 / (c * n), needs_mask=needs_mask)
    partials = pl.pallas_call(
        kernel,
        out_shape=jax.ShapeDtypeStruct((splits, c, c), jnp.float32),
        grid_spec=pltpu.PrefetchScalarGridSpec(
            num_scalar_prefetch=0,
            grid=(splits, spp),
            in_specs=[pl.BlockSpec((c, tn), feat_map)],
            out_specs=pl.BlockSpec((1, c, c), lambda s, k: (s, 0, 0)),
            scratch_shapes=[pltpu.VMEM((c, c), jnp.float32)],
        ),
        compiler_params=pltpu.CompilerParams(
            dimension_semantics=("parallel", "arbitrary"),
            vmem_limit_bytes=vmem_limit,
        ),
    )(features)
    return partials.sum(axis=0)     # tiny (splits<=2, CxC) combine epilogue


def _fused_style_loss(features, target_gram, tn, steps, needs_mask,
                      vmem_limit):
    c, n = features.shape
    kernel = functools.partial(_fused_style_loss_kernel, n=n, tn=tn,
                               inv_cn=1.0 / (c * n), inv_cc=1.0 / (c * c),
                               needs_mask=needs_mask)
    loss = pl.pallas_call(
        kernel,
        out_shape=jax.ShapeDtypeStruct((1, 1), jnp.float32),
        grid_spec=pltpu.PrefetchScalarGridSpec(
            num_scalar_prefetch=0,
            grid=(steps,),
            in_specs=[
                pl.BlockSpec((c, tn), lambda k: (0, k)),   # streamed features
                # Constant index map -> single-buffer the target gram.
                pl.BlockSpec((c, c), lambda k: (0, 0),
                             pipeline_mode=pl.Buffered(1)),
            ],
            out_specs=pl.BlockSpec((1, 1), lambda k: (0, 0)),
            scratch_shapes=[pltpu.VMEM((c, c), jnp.float32)],
        ),
        compiler_params=pltpu.CompilerParams(
            dimension_semantics=("arbitrary",),
            vmem_limit_bytes=vmem_limit,
        ),
    )(features, target_gram)
    return loss[0, 0]


def style_loss_pallas(features, target_gram, *, tile_n=None,
                      num_splits=_DEFAULT_SPLITS):
    """loss = mean((gram(features) - target_gram)^2), streamed over H*W."""
    c, n = features.shape
    tn, steps, splits, spp, needs_mask, vmem_limit = _choose_tiling(
        c, n, features.dtype.itemsize, tile_n, num_splits)

    if splits == 1:
        # Single split: fully fused gram + MSE epilogue in one kernel.
        try:
            return _fused_style_loss(features, target_gram, tn, steps,
                                     needs_mask, vmem_limit)
        except Exception:
            # Defensive fallback (e.g. pipeline_mode unsupported on this jax):
            # fall through to the split-K gram kernel + tiny JAX epilogue.
            pass

    # Split-K: partial grams (one per TensorCore on v7x) + tiny JAX epilogue.
    g = gram_matrix_pallas(features, tile_n=tile_n, num_splits=num_splits)
    diff = g - target_gram.astype(jnp.float32)
    return jnp.mean(diff * diff)


class StyleLossPallas:
    """Pallas/JAX equivalent of the PyTorch StyleLoss module."""

    def __init__(self, target_feature, *, tile_n=None,
                 num_splits=_DEFAULT_SPLITS):
        self._tile_n = tile_n
        self._num_splits = num_splits
        # Target gram is computed once at construction (detached constant).
        self.target = gram_matrix_pallas(_features(target_feature),
                                         tile_n=tile_n, num_splits=num_splits)
        self.loss = jnp.float32(0.0)

    def __call__(self, x):
        self.loss = style_loss_pallas(_features(x), self.target,
                                      tile_n=self._tile_n,
                                      num_splits=self._num_splits)
        return x   # forward returns its input unchanged


# ---------------------------------------------------------------------------
# Pure-JAX reference (for correctness check)
# ---------------------------------------------------------------------------
def _gram_ref(x_nchw):
    b, c, h, w = x_nchw.shape
    f = x_nchw.reshape(c, h * w).astype(jnp.float32)
    return (f @ f.T) / (c * h * w)


def _loss_ref(x_nchw, target_gram):
    g = _gram_ref(x_nchw)
    return jnp.mean((g - target_gram) ** 2)


# ---------------------------------------------------------------------------
if __name__ == "__main__":
    key = jax.random.PRNGKey(0)
    k1, k2, k3, k4 = jax.random.split(key, 4)

    # Case 1: even split-K path (N=256, tile=128 -> 2 tiles, 2 splits, no mask).
    B, C, H, W = 1, 8, 16, 16            # batch must be 1 (gram_matrix view)
    tgt1 = jax.random.normal(k1, (B, C, H, W), dtype=jnp.float32)
    x1 = jax.random.normal(k2, (B, C, H, W), dtype=jnp.float32)

    m1 = StyleLossPallas(tgt1, tile_n=128)
    out1 = m1(x1)
    jax.block_until_ready((out1, m1.loss))

    ref_tgt1 = _gram_ref(tgt1)
    np.testing.assert_allclose(np.asarray(m1.target), np.asarray(ref_tgt1),
                               rtol=1e-5, atol=1e-6)
    np.testing.assert_allclose(float(m1.loss), float(_loss_ref(x1, ref_tgt1)),
                               rtol=1e-5, atol=1e-6)
    np.testing.assert_allclose(np.asarray(out1), np.asarray(x1))  # pass-through

    # Case 2: ragged split-K path (N=324 -> 3 tiles of 128, 2 splits,
    # masked tail + clamped phantom tile).
    Bp, Cp, Hp, Wp = 1, 4, 18, 18
    tgt2 = jax.random.normal(k3, (Bp, Cp, Hp, Wp), dtype=jnp.float32)
    x2 = jax.random.normal(k4, (Bp, Cp, Hp, Wp), dtype=jnp.float32)

    m2 = StyleLossPallas(tgt2, tile_n=128)
    out2 = m2(x2)
    jax.block_until_ready((out2, m2.loss))

    np.testing.assert_allclose(float(m2.loss),
                               float(_loss_ref(x2, _gram_ref(tgt2))),
                               rtol=1e-5, atol=1e-6)
    np.testing.assert_allclose(np.asarray(out2), np.asarray(x2))

    # Case 3: auto byte-budget tile -> whole map in one tile -> fused-MSE path.
    m3 = StyleLossPallas(tgt1)
    out3 = m3(x1)
    jax.block_until_ready((out3, m3.loss))

    np.testing.assert_allclose(float(m3.loss), float(_loss_ref(x1, ref_tgt1)),
                               rtol=1e-5, atol=1e-6)
    np.testing.assert_allclose(np.asarray(out3), np.asarray(x1))

    print("KERNEL_OK")
</pallas_src>

<mosaic_0001>
module attributes {stable_mosaic.version = 11 : i64} {
  func.func @_partial_gram_kernel(%arg0: i32, %arg1: i32, %arg2: memref<8x128xf32, #tpu.memory_space<vmem>>, %arg3: memref<1x8x8xf32, #tpu.memory_space<vmem>>, %arg4: memref<8x8xf32, #tpu.memory_space<vmem>>) attributes {dimension_semantics = [#tpu.dimension_semantics<parallel>, #tpu.dimension_semantics<arbitrary>], iteration_bounds = array<i64: 2, 1>, scalar_prefetch = 0 : i64, scratch_operands = 1 : i64, tpu.core_type = #tpu.core_type<tc>, window_params = [{transform_indices = @transform_0, window_bounds = array<i64: 8, 128>}, {transform_indices = @transform_1, window_bounds = array<i64: 1, 8, 8>}]} {
    %c0_i32 = arith.constant 0 : i32
    %0 = arith.cmpi eq, %arg1, %c0_i32 : i32
    %1 = arith.extui %0 : i1 to i32
    %c0_i32_0 = arith.constant 0 : i32
    %2 = arith.cmpi ne, %1, %c0_i32_0 : i32
    scf.if %2 {
      %cst_8 = arith.constant 0.000000e+00 : f32
      %11 = vector.broadcast %cst_8 : f32 to vector<8x8xf32>
      %c0_9 = arith.constant 0 : index
      %c0_10 = arith.constant 0 : index
      %12 = vector.load %arg4[%c0_9, %c0_10] : memref<8x8xf32, #tpu.memory_space<vmem>>, vector<8x8xf32>
      tpu.vector_store %arg4[%c0_9, %c0_10], %11 {strides = array<i32>} : memref<8x8xf32, #tpu.memory_space<vmem>>, vector<8x8xf32>,
    } else {
    }
    %c0 = arith.constant 0 : index
    %c0_1 = arith.constant 0 : index
    %3 = vector.load %arg2[%c0, %c0_1] : memref<8x128xf32, #tpu.memory_space<vmem>>, vector<8x128xf32>
    %c0_2 = arith.constant 0 : index
    %c0_3 = arith.constant 0 : index
    %4 = vector.load %arg4[%c0_2, %c0_3] : memref<8x8xf32, #tpu.memory_space<vmem>>, vector<8x8xf32>
    %cst = arith.constant dense<0.000000e+00> : vector<8x8xf32>
    %5 = tpu.matmul %3, %3, %cst {dimension_numbers = #tpu.dot_dimension_numbers<[1], [1], [0], [0], [0, 0, 1, 0], [], []>} : vector<8x128xf32>, vector<8x128xf32>, vector<8x8xf32> -> vector<8x8xf32>
    %6 = arith.addf %4, %5 : vector<8x8xf32>
    %c0_4 = arith.constant 0 : index
    %c0_5 = arith.constant 0 : index
    %7 = vector.load %arg4[%c0_4, %c0_5] : memref<8x8xf32, #tpu.memory_space<vmem>>, vector<8x8xf32>
    tpu.vector_store %arg4[%c0_4, %c0_5], %6 {strides = array<i32>} : memref<8x8xf32, #tpu.memory_space<vmem>>, vector<8x8xf32>,
    %c0_i32_6 = arith.constant 0 : i32
    %8 = arith.cmpi eq, %arg1, %c0_i32_6 : i32
    %9 = arith.extui %8 : i1 to i32
    %c0_i32_7 = arith.constant 0 : i32
    %10 = arith.cmpi ne, %9, %c0_i32_7 : i32
    scf.if %10 {
      %c0_8 = arith.constant 0 : index
      %c0_9 = arith.constant 0 : index
      %11 = vector.load %arg4[%c0_8, %c0_9] : memref<8x8xf32, #tpu.memory_space<vmem>>, vector<8x8xf32>
      %cst_10 = arith.constant 4.8828125E-4 : f32
      %12 = vector.broadcast %cst_10 : f32 to vector<8x8xf32>
      %13 = arith.mulf %11, %12 : vector<8x8xf32>
      %14 = vector.shape_cast %13 : vector<8x8xf32> to vector<1x8x8xf32>
      %c0_11 = arith.constant 0 : index
      %c0_12 = arith.constant 0 : index
      %c0_13 = arith.constant 0 : index
      %15 = vector.load %arg3[%c0_11, %c0_12, %c0_13] : memref<1x8x8xf32, #tpu.memory_space<vmem>>, vector<1x8x8xf32>
      tpu.vector_store %arg3[%c0_11, %c0_12, %c0_13], %14 {strides = array<i32>} : memref<1x8x8xf32, #tpu.memory_space<vmem>>, vector<1x8x8xf32>,
    } else {
    }
    return
  }
  func.func @transform_0(%arg0: i32, %arg1: i32) -> (i32, i32) {
    %c1_i32 = arith.constant 1 : i32
    %0 = arith.muli %arg0, %c1_i32 : i32
    %1 = arith.addi %0, %arg1 : i32
    %c0_i32 = arith.constant 0 : i32
    %c0_i32_0 = arith.constant 0 : i32
    return %c0_i32, %1 : i32, i32
  }
  func.func @transform_1(%arg0: i32, %arg1: i32) -> (i32, i32, i32) {
    %c0_i32 = arith.constant 0 : i32
    %c0_i32_0 = arith.constant 0 : i32
    %c0_i32_1 = arith.constant 0 : i32
    return %arg0, %c0_i32, %c0_i32_0 : i32, i32, i32
  }
}

</mosaic_0001>

<bundles_post_ra>
// kernel: tpu_custom_call.1
= control target key start
LH: loop header
LB: loop body
LE: loop exit
PB: predicated region body
PF: predicated region fallthrough
CT: control target
= control target key end

     0   :  { %6 = vsyncpa [#allocation4], 0  ;;  %s673_s0 = inlined_call_operand.hbm [shape: f32[8,256], index: 0, kind: input, shape index: {}]   ;;  %s674_s1 = inlined_call_operand.hbm [shape: f32[2,8,8], index: 1, kind: output, shape index: {}]  }
   0x1   :  { %8 = vsyncpa [#allocation4 + $0x1], 0 }
   0x2   :  { %9 = vsyncpa [#allocation5], 0 }
   0x3   :  { %11 = vsyncpa [#allocation5 + $0x1], 0  ;;  %s536_s6 = smov 0   ;;  %s538_s7 = smov 0  }
   0x4   :  { %s540_s8 = smov 0   ;;  %s542_s9 = smov 0  }
   0x5   :  { %s544_s10 = smov 0   ;;  %s546_s11 = smov 0  }
   0x6 LB: > { %s328_s12 = sadd.s32 4294967295, %s520_s11   ;;  %s329_s13 = sadd.s32 4294967294, %s520_s11   ;;  %s520_s11 = sphi %s546_s11, %s17_s11   ;;  %s516_s10 = sphi %s544_s10, %s686_s10   ;;  %s512_s9 = sphi %s542_s9, %s685_s9   ;;  %s508_s8 = sphi %s540_s8, %s684_s8   ;;  %s504_s7 = sphi %s538_s7, %s683_s7   ;;  %s500_s6 = sphi %s536_s6, %s682_s6  }
   0x7   : > { %s29_s14 = sadd.s32 1, %s516_s10  ;;  %s38_s15 = sadd.s32 1, %s508_s8 }
   0x8   : > { %p31_p0 = scmp.ge.s32.totalorder %s29_s14, 2  ;;  %p45_p1 = scmp.ne.s32.totalorder %s508_s8, %s504_s7 }
   0x9   : > { %p46_p2 = scmp.eq.s32.totalorder %s520_s11, 0  ;;  %p51_p3 = scmp.ne.s32.totalorder %s504_s7, %s500_s6 }
   0xa   : > { %s688_s14 = smov (%p31_p0, %s29_s14), 0  ;;  %p52_p5 = scmp.eq.s32.totalorder %s328_s12, 0 }
   0xb   : > { %p577_p4 = por %p46_p2, %p45_p1  ;;  %s35_s17 = ssub.s32 %s516_s10, %s688_s14 }
   0xc   : > { %p75_p6 = scmp.eq.s32.totalorder %s328_s12, 1  ;;  %p36_p7 = scmp.eq.s32.totalorder %s35_s17, 0 }
   0xd   : > { %p583_p8 = por %p52_p5, %p51_p3  ;;  %p81_p10 = scmp.eq.s32.totalorder %s329_s13, 1 }
   0xe   : > { %p587_p9 = por %p75_p6, %p45_p1  ;;  %p360_p13 = scmp.lt.s32.totalorder %s520_s11, 2 }
   0xf   : > { %s592_s20 = scalar_select %p36_p7, %s508_s8, %s38_s15  }
  0x10   : > { %p594_p11 = por %p81_p10, %p51_p3  ;;  %s101_s22 = sand.u32 1, %s508_s8  }
  0x11   : > { %s332_s23 = sshll.u32 %s101_s22, 3  ;;  %s333_s24 = sshll.u32 %s516_s10, 7 }
  0x12   : > { %s678_s21 = scalar_select %p594_p11, 1, 0 }
  0x13   : > { %s111_s27 = scalar_lea.hbm %s673_s0, %s333_s24  ;;  %s105_s28 = scalar_lea.vmem [#allocation3], %s332_s23 }
  0x14   : > { %s113_s29 = sshll.u32 %s105_s28, 4  ;;  %p607_p0 = pnand %p360_p13, %p577_p4  ;;  %s114_s29 = int_to_ptr.vmem [resolvable:$true] %s113_s29 }
  0x15   : > { %p334_p1 = scmp.ge.s32.totalorder %s520_s11, 1  ;;  %p118_p2 = scmp.lt.s32.totalorder %s520_s11, 3 }
  0x16   : > { %s102_s2 = scalar_lea.sflag [#allocation4], %s101_s22  ;;  %p414_p3 = pneg %p607_p0 }
  0x17   : > { %s425_s3 = scalar_lea.vmem %s114_s29, 128  ;;  %s522_s4 = smov [#allocation3]  }
  0x18   : > { %p426_p5 = scmp.ne.s32.totalorder %s114_s29, %s425_s3  ;;  %s430_s5 = sshll.u32 %s522_s4, 4  ;;  %s431_s5 = int_to_ptr.vmem [resolvable:$false] %s430_s5 }
  0x19   : > { %s432_s12 = scalar_lea.vmem %s431_s5, 256  ;;  %p433_p10 = scmp.lt.s32.totalorder %s114_s29, %s431_s5 }
  0x1a   : > { %p428_p6 = pnand %p426_p5, %p414_p3  ;;  %p434_p12 = scmp.lt.s32.totalorder %s432_s12, %s425_s3 }
  0x1c   : > { %p429_p7 = pneg %p428_p6  ;;  %p435_p4 = por %p434_p12, %p433_p10 }
  0x1e   : > { %p436_p13 = pnand %p435_p4, %p429_p7 }
  0x20   : > { %439 = shalt.err (!%p436_p13)
}
  0x21   : > { %355 = dma.hbm_to_vmem [thread:$0]  (!%p607_p0), %s111_s27, 128, %s114_s29, %s102_s2  }
  0x22   : > { %p119_p11 = pnand %p334_p1, %p118_p2 }
  0x23   : > { %s622_s13 = sand.u32 (!%p119_p11), 1, %s504_s7  }
  0x24   : > { %122 = sbr.rel (%p119_p11) target bundleno = 265 (0x109), region = 24  ;;  %s335_s15 = sshll.u32 (!%p119_p11), %s622_s13, 3 }
  0x25   : > { %s125_s16 = scalar_lea.sflag (!%p119_p11), [#allocation4], %s622_s13  ;;  %s128_s17 = scalar_lea.vmem (!%p119_p11), [#allocation3], %s335_s15 }
  0x29   : > { %491 = dma.done.wait (%p583_p8), %s125_s16, 128  }
  0x2a   : > { %493 = vsyncadd (%p583_p8), %s125_s16, 4294967168  ;;  %vm152_vm0 = vcmask 64512   ;;  %v523_v0 = vmov 0.0   ;;  %vm524_vm1 = vmmov 0   ;;  %v154_v1 = vld [vmem:[%s128_s17] sm:$0xff]  ;;  %s338_s18 = sshll.u32 %s512_s9, 7 }
  0x2b   : > { %153 = vst.msk [vmem:[#allocation2] sm:$0xff] %vm152_vm0, %v523_v0  ;;  %343 = vmatprep.subr.mxu0 %v523_v0  ;;  %345 = vmatprep.mubr.msk.f32.mxu0 %vm524_vm1, %v523_v0  ;;  %s146_s22 = scalar_lea.vmem [#allocation6], %s335_s15  ;;  %s247_s26 = scalar_lea.hbm %s674_s1, %s338_s18 }
  0x2c   : > { %344 = vmatpush3.xpose.msra.mxu0 %v154_v1  ;;  %s249_s23 = sshll.u32 %s146_s22, 4  ;;  %s236_s27 = scalar_lea.sflag [#allocation5], %s622_s13  ;;  %s250_s23 = int_to_ptr.vmem [resolvable:$true] %s249_s23 }
  0x2d   : > { %s440_s28 = scalar_lea.vmem %s250_s23, 128  ;;  %s525_s29 = smov [#allocation6]  }
  0x2e   : > { %p441_p8 = scmp.ne.s32.totalorder %s250_s23, %s440_s28  ;;  %s444_s30 = sshll.u32 %s525_s29, 4  ;;  %s445_s30 = int_to_ptr.vmem [resolvable:$false] %s444_s30 }
  0x2f   : > { %346 = vmatmul.mubr.f32.vlgmr.msra.gmra.mxu0 %v154_v1  ;;  %s446_s9 = scalar_lea.vmem %s445_s30, 256  ;;  %p447_p0 = scmp.lt.s32.totalorder %s250_s23, %s445_s30 }
  0x30   : > { %p442_p11 = pnand %p441_p8, %p587_p9  ;;  %p448_p1 = scmp.lt.s32.totalorder %s446_s9, %s440_s28 }
  0x32   : > { %v155_v2 = vld [vmem:[#allocation2] sm:$0xff]  ;;  %p443_p12 = pneg %p442_p11  ;;  %p449_p2 = por %p448_p1, %p447_p0 }
  0x34   : > { %p450_p3 = pnand %p449_p2, %p443_p12 }
  0xef   : > { %v222_v3 = vpop.f32.mrf.mxu0 }
  0xf0   : > { %v226_v4 = vadd.f32 %v222_v3, %v155_v2 }
  0xf1   : > { %v347_v5 = vpop.f32.mrf.mxu0 }
  0xf2   : > { %228 = vst.msk [vmem:[#allocation2] sm:$0xff] %vm152_vm0, %v226_v4 }
  0xf9   : > { %v232_v6 = vld [vmem:[#allocation2] sm:$0xff] }
  0xfa   : > { %v233_v7 = vmul.f32 0.00048828125, %v232_v6 }
  0xfc   : > { %234 = vst.msk [vmem:[%s146_s22] sm:$0xff] %vm152_vm0, %v233_v7 }
  0xfd   : > { %453 = shalt.err (!%p450_p3)
}
  0xfe   : > { %s454_s2 = scalar_lea.hbm %s247_s26, 128  ;;  %s458_s5 = scalar_lea.hbm %s674_s1, 256 }
  0xff   : > { %p455_p5 = scmp.ne.s32.totalorder %s247_s26, %s454_s2  ;;  %p459_p10 = scmp.lt.s32.totalorder %s247_s26, %s674_s1 }
 0x100   : > { %p460_p4 = scmp.lt.s32.totalorder %s458_s5, %s454_s2 }
 0x101   : > { %p456_p6 = pnand %p455_p5, %p587_p9 }
 0x102   : > { %p461_p13 = por %p460_p4, %p459_p10 }
 0x103   : > { %p457_p7 = pneg %p456_p6 }
 0x105   : > { %p462_p8 = pnand %p461_p13, %p457_p7 }
 0x107   : > { %465 = shalt.err (!%p462_p8)
}
 0x108   : > { %350 = dma.vmem_to_hbm [thread:$0]  (%p587_p9), %s250_s23, 128, %s247_s26, %s236_s27  }
 0x109 PF: > { %s261_s15 = sand.u32 1, %s500_s6   ;;  %p680_p11 = scmp.ne.s32.totalorder %s678_s21, 0 }
 0x10a   : > { %p681_p12 = scmp.ge.s32.totalorder %s520_s11, 2  ;;  %s262_s16 = scalar_lea.sflag [#allocation5], %s261_s15 }
 0x10c   : > { %p357_p0 = pnand %p681_p12, %p680_p11 }
 0x10e   : > { %p358_p1 = pneg %p357_p0 }
 0x110   : > { %495 = dma.done.wait (%p358_p1), %s262_s16, 128  }
 0x111   : > { %497 = vsyncadd (%p358_p1), %s262_s16, 4294967168  ;;  %s17_s11 = sadd.s32 1, %s520_s11   ;;  %s682_s6 = smov %s504_s7 }
 0x112   : > { %p14_p2 = scmp.ge.s32.totalorder %s17_s11, 4   ;;  %s683_s7 = smov %s508_s8 }
 0x113   : > { %s684_s8 = smov %s592_s20  ;;  %s685_s9 = smov %s516_s10 }
 0x114   : > { %s686_s10 = smov %s688_s14  ;;  %16 = sbr.rel (!%p14_p2) target bundleno = 6 (0x6), region = 77 }
 0x119   :  { %267 = vsyncpa [#allocation4], 1 }
 0x11a   :  { %269 = vsyncpa [#allocation4 + $0x1], 1 }
 0x11b   :  { %270 = vsyncpa [#allocation5], 1 }
 0x11c   :  { %272 = vsyncpa [#allocation5 + $0x1], 1 }

</bundles_post_ra>
